<compile_context>
chip_gen: v7x
topology: tpu7x:2x2x1
jax: 0.10.0
libtpu: 0.0.40
codegen_flags: <defaults>
</compile_context>

<pallas_src>
import jax
import jax.numpy as jnp
from jax.experimental import pallas as pl
from jax.experimental.pallas import tpu as pltpu

EPS = 1e-5


def _residual_block_kernel(alpha_ref,              # SMEM (1,)   PReLU slope
                           x_ref,                  # VMEM (N, H, WC) f32
                           w1_ref, w2_ref,         # VMEM (3*WC, WC) bf16 merged weights
                           g1_ref, b1_ref,         # VMEM (1, WC) f32 (tiled over W)
                           g2_ref, b2_ref,         # VMEM (1, WC) f32
                           p_ref,                  # VMEM (WC, WC) f32 channel-fold / (N*H*W)
                           out_ref):               # VMEM (N, H, WC) f32
    N, H, WC = x_ref.shape
    NH = N * H
    pmat = p_ref[...]                               # load the fold matrix once

    # Row-within-image index, hoisted (used by both convs): marks the H
    # boundaries where the wrapped sublane rotation must be zeroed.
    row_in_img = jax.lax.broadcasted_iota(jnp.int32, (NH, WC), 0) % H

    def conv3x3(y, w_ref):
        # y: (NH, WC) f32.  One MXU matmul per conv: the kh shift is built as
        # two sublane rotations (+ boundary zeroing), the kw shift / W-border
        # zero padding / channel mixing all live in the merged weight.
        zero = jnp.zeros_like(y)
        up = jnp.where(row_in_img == 0, zero, pltpu.roll(y, 1, 0))        # row h-1
        down = jnp.where(row_in_img == H - 1, zero, pltpu.roll(y, NH - 1, 0))  # row h+1
        lhs = jnp.concatenate([up, y, down], axis=-1).astype(jnp.bfloat16)  # (NH, 3*WC)
        return jnp.dot(lhs, w_ref[...], preferred_element_type=jnp.float32)

    def batchnorm(y, g_ref, b_ref):
        # One-pass training-mode batch stats (biased variance).  The per-(w,c)
        # lane sums are folded to per-channel stats (and broadcast back) with
        # a single (2, WC) x (WC, WC) matmul against pmat; stays f32.
        s = jnp.concatenate([jnp.sum(y, axis=0, keepdims=True),
                             jnp.sum(y * y, axis=0, keepdims=True)], axis=0)
        r = jnp.dot(s, pmat, preferred_element_type=jnp.float32)          # (2, WC)
        mean = r[0:1, :]
        var = jnp.maximum(r[1:2, :] - mean * mean, 0.0)
        scale = g_ref[...] * jax.lax.rsqrt(var + EPS)
        shift = b_ref[...] - mean * scale
        return y * scale + shift

    x = x_ref[...].reshape(NH, WC)                  # layout-trivial (H % 8 == 0)

    # ---- conv1 -> bn1 -> PReLU ----
    o = conv3x3(x, w1_ref)
    o = batchnorm(o, g1_ref, b1_ref)
    a = alpha_ref[0]
    o = jnp.where(o > 0, o, a * o)

    # ---- conv2 -> bn2 ----
    o = conv3x3(o, w2_ref)
    o = batchnorm(o, g2_ref, b2_ref)

    # ---- residual add ----
    out_ref[...] = (x + o).reshape(N, H, WC)


def _build_conv_weight(w_pt, W):
    """(Cout, Cin, 3, 3) -> merged (3*W*Cin, W*Cout) block-tridiagonal bf16 weight.

    Row block kh, block (win, wout) = w_pt[:, :, kh, kw].T with kw = win-wout+1
    (zero if |win - wout| > 1): one matmul per conv folds the kh AND kw shifts,
    the W-boundary zero padding and the channel mixing into a depth-3*W*Cin
    contraction on the MXU.
    """
    taps = jnp.transpose(w_pt.astype(jnp.float32), (2, 3, 1, 0))   # (kh, kw, Cin, Cout)
    slabs = []
    for kh in range(3):
        m = sum(jnp.kron(jnp.eye(W, k=1 - kw, dtype=jnp.float32), taps[kh, kw])
                for kw in range(3))
        slabs.append(m)
    return jnp.concatenate(slabs, axis=0).astype(jnp.bfloat16)     # (3*W*Cin, W*Cout)


def residual_block(x_nchw, params):
    x_nchw = x_nchw.astype(jnp.float32)
    N, C, H, W = x_nchw.shape
    WC = W * C
    NH = N * H
    assert WC % 128 == 0 and H % 8 == 0, "lane-folded layout assumes W*C % 128 == 0, H % 8 == 0"

    # NCHW -> lane-folded (N, H, W*C); W*C sits on the 128-lane axis.
    x = jnp.transpose(x_nchw, (0, 2, 3, 1)).reshape(N, H, WC)

    w1 = _build_conv_weight(params["w1"], W)
    w2 = _build_conv_weight(params["w2"], W)
    # BN affine params tiled across the W lane blocks (conv biases are dropped:
    # they are cancelled exactly by the batch-mean subtraction).
    g1 = jnp.tile(params["g1"].astype(jnp.float32), W).reshape(1, WC)
    b1 = jnp.tile(params["beta1"].astype(jnp.float32), W).reshape(1, WC)
    g2 = jnp.tile(params["g2"].astype(jnp.float32), W).reshape(1, WC)
    b2 = jnp.tile(params["beta2"].astype(jnp.float32), W).reshape(1, WC)
    # channel-fold matrix: (s @ p)[w*C+c] = sum_w' s[w'*C+c] / (N*H*W)
    p = jnp.tile(jnp.eye(C, dtype=jnp.float32), (W, W)) / float(N * H * W)
    alpha = params["alpha"].reshape(1).astype(jnp.float32)

    vmem = pl.BlockSpec(memory_space=pltpu.MemorySpace.VMEM)
    smem = pl.BlockSpec(memory_space=pltpu.MemorySpace.SMEM)

    flops = 2 * (2 * NH * (3 * WC) * WC) + 2 * (2 * 2 * WC * WC)
    bytes_accessed = (2 * N * H * WC * 4            # x in + out (f32)
                      + 2 * 3 * WC * WC * 2         # two merged bf16 weights
                      + WC * WC * 4 + 4 * WC * 4)   # pmat + BN params

    out = pl.pallas_call(
        _residual_block_kernel,
        out_shape=jax.ShapeDtypeStruct((N, H, WC), jnp.float32),
        in_specs=[smem] + [vmem] * 8,
        out_specs=vmem,
        compiler_params=pltpu.CompilerParams(vmem_limit_bytes=32 * 1024 * 1024),
        cost_estimate=pl.CostEstimate(flops=flops, transcendentals=2 * WC,
                                      bytes_accessed=bytes_accessed),
    )(alpha, x, w1, w2, g1, b1, g2, b2, p)

    return jnp.transpose(out.reshape(N, H, W, C), (0, 3, 1, 2))     # -> NCHW


def reference(x_nchw, params):
    # plain-JAX f32 reference with the module's exact math (incl. conv biases)
    x = jnp.transpose(x_nchw, (0, 2, 3, 1)).astype(jnp.float32)
    N, H, W, C = x.shape

    def conv(xin, w, b):
        xp = jnp.pad(xin, ((0, 0), (1, 1), (1, 1), (0, 0)))
        acc = jnp.zeros((N, H, W, C), jnp.float32)
        for kh in range(3):
            for kw in range(3):
                patch = xp[:, kh:kh + H, kw:kw + W, :]
                acc = acc + jnp.einsum("nhwc,dc->nhwd", patch, w[:, :, kh, kw])
        return acc + b.reshape(1, 1, 1, C)

    def bn(y, g, b):
        mean = jnp.mean(y, axis=(0, 1, 2), keepdims=True)
        var = jnp.mean((y - mean) ** 2, axis=(0, 1, 2), keepdims=True)
        return ((y - mean) * jax.lax.rsqrt(var + EPS) * g.reshape(1, 1, 1, C)
                + b.reshape(1, 1, 1, C))

    o = conv(x, params["w1"], params["b1"])
    o = bn(o, params["g1"], params["beta1"])
    a = params["alpha"][0]
    o = jnp.where(o > 0, o, a * o)
    o = conv(o, params["w2"], params["b2"])
    o = bn(o, params["g2"], params["beta2"])
    return jnp.transpose(x + o, (0, 3, 1, 2))


if __name__ == "__main__":
    N, C, H, W = 2, 8, 16, 16                      # W*C = 128 -> fully lane-dense
    key = jax.random.PRNGKey(0)
    ks = jax.random.split(key, 9)
    bound = float(1.0 / (C * 9) ** 0.5)            # PyTorch Conv2d default init range

    params = {
        "w1": jax.random.uniform(ks[0], (C, C, 3, 3), jnp.float32, -bound, bound),
        "b1": jax.random.uniform(ks[1], (C,), jnp.float32, -bound, bound),
        "w2": jax.random.uniform(ks[2], (C, C, 3, 3), jnp.float32, -bound, bound),
        "b2": jax.random.uniform(ks[3], (C,), jnp.float32, -bound, bound),
        "g1": 1.0 + 0.1 * jax.random.normal(ks[4], (C,), jnp.float32),
        "beta1": 0.1 * jax.random.normal(ks[5], (C,), jnp.float32),
        "g2": 1.0 + 0.1 * jax.random.normal(ks[6], (C,), jnp.float32),
        "beta2": 0.1 * jax.random.normal(ks[7], (C,), jnp.float32),
        "alpha": jnp.array([0.25], jnp.float32),   # nn.PReLU() default single slope
    }

    x = jax.random.normal(jax.random.PRNGKey(1), (N, C, H, W), jnp.float32)

    out = jax.block_until_ready(residual_block(x, params))
    ref = jax.block_until_ready(reference(x, params))

    assert out.shape == (N, C, H, W)
    max_err = float(jnp.max(jnp.abs(out - ref)))
    assert max_err < 5e-2, f"max abs err too large: {max_err}"
    print("KERNEL_OK")
</pallas_src>

<mosaic_0001>
module attributes {stable_mosaic.version = 11 : i64} {
  func.func @_residual_block_kernel(%arg0: memref<1xf32, #tpu.memory_space<smem>>, %arg1: memref<2x16x128xf32, #tpu.memory_space<vmem>>, %arg2: memref<384x128xbf16, #tpu.memory_space<vmem>>, %arg3: memref<384x128xbf16, #tpu.memory_space<vmem>>, %arg4: memref<1x128xf32, #tpu.memory_space<vmem>>, %arg5: memref<1x128xf32, #tpu.memory_space<vmem>>, %arg6: memref<1x128xf32, #tpu.memory_space<vmem>>, %arg7: memref<1x128xf32, #tpu.memory_space<vmem>>, %arg8: memref<128x128xf32, #tpu.memory_space<vmem>>, %arg9: memref<2x16x128xf32, #tpu.memory_space<vmem>>) attributes {dimension_semantics = [], scalar_prefetch = 0 : i64, scratch_operands = 0 : i64, tpu.core_type = #tpu.core_type<tc>} {
    %c0 = arith.constant 0 : index
    %c0_0 = arith.constant 0 : index
    %0 = vector.load %arg8[%c0, %c0_0] : memref<128x128xf32, #tpu.memory_space<vmem>>, vector<128x128xf32>
    %1 = tpu.iota {dimensions = array<i32: 0>} : vector<32x128xi32>
    %c16_i32 = arith.constant 16 : i32
    %c0_i32 = arith.constant 0 : i32
    %2 = arith.cmpi eq, %c16_i32, %c0_i32 : i32
    %c1_i32 = arith.constant 1 : i32
    %3 = arith.select %2, %c1_i32, %c16_i32 : i32
    %4 = vector.broadcast %3 : i32 to vector<32x128xi32>
    %5 = arith.remsi %1, %4 : vector<32x128xi32>
    %c0_i32_1 = arith.constant 0 : i32
    %6 = vector.broadcast %c0_i32_1 : i32 to vector<32x128xi32>
    %7 = arith.cmpi ne, %5, %6 : vector<32x128xi32>
    %c0_i32_2 = arith.constant 0 : i32
    %8 = vector.broadcast %c0_i32_2 : i32 to vector<32x128xi32>
    %9 = arith.cmpi slt, %5, %8 : vector<32x128xi32>
    %c0_i32_3 = arith.constant 0 : i32
    %10 = arith.cmpi slt, %3, %c0_i32_3 : i32
    %11 = vector.broadcast %10 : i1 to vector<32x128xi1>
    %12 = vector.broadcast %11 : vector<32x128xi1> to vector<32x128xi1>
    %13 = arith.xori %9, %12 : vector<32x128xi1>
    %14 = arith.andi %13, %7 : vector<32x128xi1>
    %15 = vector.broadcast %3 : i32 to vector<32x128xi32>
    %16 = arith.addi %5, %15 : vector<32x128xi32>
    %17 = arith.select %14, %16, %5 : vector<32x128xi1>, vector<32x128xi32>
    %c0_4 = arith.constant 0 : index
    %c0_5 = arith.constant 0 : index
    %c0_6 = arith.constant 0 : index
    %18 = vector.load %arg1[%c0_4, %c0_5, %c0_6] : memref<2x16x128xf32, #tpu.memory_space<vmem>>, vector<2x16x128xf32>
    %19 = vector.shape_cast %18 : vector<2x16x128xf32> to vector<32x128xf32>
    %cst = arith.constant 0.000000e+00 : f32
    %20 = vector.broadcast %cst : f32 to vector<32x128xf32>
    %c0_i32_7 = arith.constant 0 : i32
    %21 = vector.broadcast %c0_i32_7 : i32 to vector<32x128xi32>
    %22 = arith.cmpi eq, %17, %21 : vector<32x128xi32>
    %c1_i32_8 = arith.constant 1 : i32
    %23 = tpu.dynamic_rotate %19 by %c1_i32_8 dim 0 : vector<32x128xf32>, i32 -> vector<32x128xf32>
    %24 = arith.select %22, %20, %23 : vector<32x128xi1>, vector<32x128xf32>
    %c15_i32 = arith.constant 15 : i32
    %25 = vector.broadcast %c15_i32 : i32 to vector<32x128xi32>
    %26 = arith.cmpi eq, %17, %25 : vector<32x128xi32>
    %c31_i32 = arith.constant 31 : i32
    %27 = tpu.dynamic_rotate %19 by %c31_i32 dim 0 : vector<32x128xf32>, i32 -> vector<32x128xf32>
    %28 = arith.select %26, %20, %27 : vector<32x128xi1>, vector<32x128xf32>
    %29 = tpu.concatenate %24, %19, %28 in 1 : vector<32x128xf32>, vector<32x128xf32>, vector<32x128xf32> -> vector<32x384xf32>
    %30 = arith.truncf %29 : vector<32x384xf32> to vector<32x384xbf16>
    %c0_9 = arith.constant 0 : index
    %c0_10 = arith.constant 0 : index
    %31 = vector.load %arg2[%c0_9, %c0_10] : memref<384x128xbf16, #tpu.memory_space<vmem>>, vector<384x128xbf16>
    %cst_11 = arith.constant dense<0.000000e+00> : vector<32x128xf32>
    %32 = tpu.matmul %30, %31, %cst_11 {dimension_numbers = #tpu.dot_dimension_numbers<[1], [0], [0], [1], [0, 0, 1, 1], [], []>} : vector<32x384xbf16>, vector<384x128xbf16>, vector<32x128xf32> -> vector<32x128xf32>
    %cst_12 = arith.constant dense<0.000000e+00> : vector<128xf32>
    %33 = vector.multi_reduction <add>, %32, %cst_12 [0] : vector<32x128xf32> to vector<128xf32>
    %34 = vector.shape_cast %33 : vector<128xf32> to vector<1x128xf32>
    %35 = arith.mulf %32, %32 : vector<32x128xf32>
    %cst_13 = arith.constant dense<0.000000e+00> : vector<128xf32>
    %36 = vector.multi_reduction <add>, %35, %cst_13 [0] : vector<32x128xf32> to vector<128xf32>
    %37 = vector.shape_cast %36 : vector<128xf32> to vector<1x128xf32>
    %38 = tpu.concatenate %34, %37 in 0 : vector<1x128xf32>, vector<1x128xf32> -> vector<2x128xf32>
    %cst_14 = arith.constant dense<0.000000e+00> : vector<2x128xf32>
    %39 = tpu.matmul %38, %0, %cst_14 {dimension_numbers = #tpu.dot_dimension_numbers<[1], [0], [0], [1], [0, 0, 1, 1], [], []>} : vector<2x128xf32>, vector<128x128xf32>, vector<2x128xf32> -> vector<2x128xf32>
    %40 = vector.extract_strided_slice %39 {offsets = [0, 0], sizes = [1, 128], strides = [1, 1]} : vector<2x128xf32> to vector<1x128xf32>
    %41 = vector.extract_strided_slice %39 {offsets = [1, 0], sizes = [1, 128], strides = [1, 1]} : vector<2x128xf32> to vector<1x128xf32>
    %42 = arith.mulf %40, %40 : vector<1x128xf32>
    %43 = arith.subf %41, %42 : vector<1x128xf32>
    %cst_15 = arith.constant 0.000000e+00 : f32
    %44 = vector.broadcast %cst_15 : f32 to vector<1x128xf32>
    %45 = arith.maximumf %43, %44 : vector<1x128xf32>
    %c0_16 = arith.constant 0 : index
    %c0_17 = arith.constant 0 : index
    %46 = vector.load %arg4[%c0_16, %c0_17] : memref<1x128xf32, #tpu.memory_space<vmem>>, vector<1x128xf32>
    %cst_18 = arith.constant 9.99999974E-6 : f32
    %47 = vector.broadcast %cst_18 : f32 to vector<1x128xf32>
    %48 = arith.addf %45, %47 : vector<1x128xf32>
    %49 = math.rsqrt %48 : vector<1x128xf32>
    %50 = arith.mulf %46, %49 : vector<1x128xf32>
    %c0_19 = arith.constant 0 : index
    %c0_20 = arith.constant 0 : index
    %51 = vector.load %arg5[%c0_19, %c0_20] : memref<1x128xf32, #tpu.memory_space<vmem>>, vector<1x128xf32>
    %52 = arith.mulf %40, %50 : vector<1x128xf32>
    %53 = arith.subf %51, %52 : vector<1x128xf32>
    %54 = vector.broadcast %50 : vector<1x128xf32> to vector<32x128xf32>
    %55 = arith.mulf %32, %54 : vector<32x128xf32>
    %56 = vector.broadcast %53 : vector<1x128xf32> to vector<32x128xf32>
    %57 = arith.addf %55, %56 : vector<32x128xf32>
    %c0_21 = arith.constant 0 : index
    %58 = memref.load %arg0[%c0_21] : memref<1xf32, #tpu.memory_space<smem>>
    %cst_22 = arith.constant 0.000000e+00 : f32
    %59 = vector.broadcast %cst_22 : f32 to vector<32x128xf32>
    %60 = arith.cmpf ogt, %57, %59 : vector<32x128xf32>
    %61 = vector.broadcast %58 : f32 to vector<32x128xf32>
    %62 = arith.mulf %61, %57 : vector<32x128xf32>
    %63 = arith.select %60, %57, %62 : vector<32x128xi1>, vector<32x128xf32>
    %cst_23 = arith.constant 0.000000e+00 : f32
    %64 = vector.broadcast %cst_23 : f32 to vector<32x128xf32>
    %c0_i32_24 = arith.constant 0 : i32
    %65 = vector.broadcast %c0_i32_24 : i32 to vector<32x128xi32>
    %66 = arith.cmpi eq, %17, %65 : vector<32x128xi32>
    %c1_i32_25 = arith.constant 1 : i32
    %67 = tpu.dynamic_rotate %63 by %c1_i32_25 dim 0 : vector<32x128xf32>, i32 -> vector<32x128xf32>
    %68 = arith.select %66, %64, %67 : vector<32x128xi1>, vector<32x128xf32>
    %c15_i32_26 = arith.constant 15 : i32
    %69 = vector.broadcast %c15_i32_26 : i32 to vector<32x128xi32>
    %70 = arith.cmpi eq, %17, %69 : vector<32x128xi32>
    %c31_i32_27 = arith.constant 31 : i32
    %71 = tpu.dynamic_rotate %63 by %c31_i32_27 dim 0 : vector<32x128xf32>, i32 -> vector<32x128xf32>
    %72 = arith.select %70, %64, %71 : vector<32x128xi1>, vector<32x128xf32>
    %73 = tpu.concatenate %68, %63, %72 in 1 : vector<32x128xf32>, vector<32x128xf32>, vector<32x128xf32> -> vector<32x384xf32>
    %74 = arith.truncf %73 : vector<32x384xf32> to vector<32x384xbf16>
    %c0_28 = arith.constant 0 : index
    %c0_29 = arith.constant 0 : index
    %75 = vector.load %arg3[%c0_28, %c0_29] : memref<384x128xbf16, #tpu.memory_space<vmem>>, vector<384x128xbf16>
    %cst_30 = arith.constant dense<0.000000e+00> : vector<32x128xf32>
    %76 = tpu.matmul %74, %75, %cst_30 {dimension_numbers = #tpu.dot_dimension_numbers<[1], [0], [0], [1], [0, 0, 1, 1], [], []>} : vector<32x384xbf16>, vector<384x128xbf16>, vector<32x128xf32> -> vector<32x128xf32>
    %cst_31 = arith.constant dense<0.000000e+00> : vector<128xf32>
    %77 = vector.multi_reduction <add>, %76, %cst_31 [0] : vector<32x128xf32> to vector<128xf32>
    %78 = vector.shape_cast %77 : vector<128xf32> to vector<1x128xf32>
    %79 = arith.mulf %76, %76 : vector<32x128xf32>
    %cst_32 = arith.constant dense<0.000000e+00> : vector<128xf32>
    %80 = vector.multi_reduction <add>, %79, %cst_32 [0] : vector<32x128xf32> to vector<128xf32>
    %81 = vector.shape_cast %80 : vector<128xf32> to vector<1x128xf32>
    %82 = tpu.concatenate %78, %81 in 0 : vector<1x128xf32>, vector<1x128xf32> -> vector<2x128xf32>
    %cst_33 = arith.constant dense<0.000000e+00> : vector<2x128xf32>
    %83 = tpu.matmul %82, %0, %cst_33 {dimension_numbers = #tpu.dot_dimension_numbers<[1], [0], [0], [1], [0, 0, 1, 1], [], []>} : vector<2x128xf32>, vector<128x128xf32>, vector<2x128xf32> -> vector<2x128xf32>
    %84 = vector.extract_strided_slice %83 {offsets = [0, 0], sizes = [1, 128], strides = [1, 1]} : vector<2x128xf32> to vector<1x128xf32>
    %85 = vector.extract_strided_slice %83 {offsets = [1, 0], sizes = [1, 128], strides = [1, 1]} : vector<2x128xf32> to vector<1x128xf32>
    %86 = arith.mulf %84, %84 : vector<1x128xf32>
    %87 = arith.subf %85, %86 : vector<1x128xf32>
    %cst_34 = arith.constant 0.000000e+00 : f32
    %88 = vector.broadcast %cst_34 : f32 to vector<1x128xf32>
    %89 = arith.maximumf %87, %88 : vector<1x128xf32>
    %c0_35 = arith.constant 0 : index
    %c0_36 = arith.constant 0 : index
    %90 = vector.load %arg6[%c0_35, %c0_36] : memref<1x128xf32, #tpu.memory_space<vmem>>, vector<1x128xf32>
    %cst_37 = arith.constant 9.99999974E-6 : f32
    %91 = vector.broadcast %cst_37 : f32 to vector<1x128xf32>
    %92 = arith.addf %89, %91 : vector<1x128xf32>
    %93 = math.rsqrt %92 : vector<1x128xf32>
    %94 = arith.mulf %90, %93 : vector<1x128xf32>
    %c0_38 = arith.constant 0 : index
    %c0_39 = arith.constant 0 : index
    %95 = vector.load %arg7[%c0_38, %c0_39] : memref<1x128xf32, #tpu.memory_space<vmem>>, vector<1x128xf32>
    %96 = arith.mulf %84, %94 : vector<1x128xf32>
    %97 = arith.subf %95, %96 : vector<1x128xf32>
    %98 = vector.broadcast %94 : vector<1x128xf32> to vector<32x128xf32>
    %99 = arith.mulf %76, %98 : vector<32x128xf32>
    %100 = vector.broadcast %97 : vector<1x128xf32> to vector<32x128xf32>
    %101 = arith.addf %99, %100 : vector<32x128xf32>
    %102 = arith.addf %19, %101 : vector<32x128xf32>
    %103 = vector.shape_cast %102 : vector<32x128xf32> to vector<2x16x128xf32>
    %c0_40 = arith.constant 0 : index
    %c0_41 = arith.constant 0 : index
    %c0_42 = arith.constant 0 : index
    %104 = vector.load %arg9[%c0_40, %c0_41, %c0_42] : memref<2x16x128xf32, #tpu.memory_space<vmem>>, vector<2x16x128xf32>
    tpu.vector_store %arg9[%c0_40, %c0_41, %c0_42], %103 {strides = array<i32>} : memref<2x16x128xf32, #tpu.memory_space<vmem>>, vector<2x16x128xf32>,
    return
  }
}

</mosaic_0001>

<bundles_post_ra>
// kernel: tpu_custom_call.1
= control target key start
LH: loop header
LB: loop body
LE: loop exit
PB: predicated region body
PF: predicated region fallthrough
CT: control target
= control target key end

     0   :  { %15 = vsyncpa [#allocation4], 0  ;;  %s2048_s0 = inlined_call_operand.<no memory space> [shape: f32[1], index: 0, kind: input, shape index: {}]   ;;  %s2049_s1 = inlined_call_operand.hbm [shape: f32[2,16,128], index: 1, kind: input, shape index: {}]   ;;  %s2050_s2 = inlined_call_operand.hbm [shape: bf16[384,128], index: 2, kind: input, shape index: {}]   ;;  %s2051_s3 = inlined_call_operand.hbm [shape: bf16[384,128], index: 3, kind: input, shape index: {}]   ;;  %s2052_s4 = inlined_call_operand.vmem [shape: f32[1,128], index: 4, kind: input, shape index: {}]   ;;  %s2053_s5 = inlined_call_operand.vmem [shape: f32[1,128], index: 5, kind: input, shape index: {}]   ;;  %s2054_s6 = inlined_call_operand.vmem [shape: f32[1,128], index: 6, kind: input, shape index: {}]   ;;  %s2055_s7 = inlined_call_operand.vmem [shape: f32[1,128], index: 7, kind: input, shape index: {}]   ;;  %s2056_s8 = inlined_call_operand.hbm [shape: f32[128,128], index: 8, kind: input, shape index: {}]   ;;  %s2057_s9 = inlined_call_operand.hbm [shape: f32[2,16,128], index: 9, kind: output, shape index: {}]  }
   0x1   :  { %16 = vsyncpa [#allocation7], 0 }
   0x2   :  { %17 = vsyncpa [#allocation10], 0 }
   0x3   :  { %18 = vsyncpa [#allocation5], 0  ;;  %s1677_s30 = smov [#allocation6]   ;;  %s1559_s13 = scalar_lea.hbm %s2050_s2, 3072 }
   0x4   :  { %s38_s10 = sshll.u32 %s1677_s30, 4  ;;  %p1560_p0 = scmp.ne.s32.totalorder %s2050_s2, %s1559_s13  ;;  %s39_s10 = int_to_ptr.vmem [resolvable:$true] %s38_s10 }
   0x5   :  { %p1563_p1 = scmp.lt.u32.totalorder %s1559_s13, %s2050_s2 }
   0x7   :  { %p1565_p2 = pnand %p1563_p1, %p1560_p0 }
   0x9   :  { %1568 = shalt.err (!%p1565_p2)
}
   0xa   :  { %s1569_s18 = scalar_lea.vmem %s39_s10, 3072  ;;  %p1574_p4 = scmp.lt.s32.totalorder %s39_s10, %s39_s10 }
   0xb   :  { %p1570_p3 = scmp.ne.s32.totalorder %s39_s10, %s1569_s18  ;;  %p1575_p5 = scmp.lt.s32.totalorder %s1569_s18, %s1569_s18 }
   0xd   :  { %p1576_p6 = por %p1575_p5, %p1574_p4 }
   0xf   :  { %p1577_p7 = pnand %p1576_p6, %p1570_p3 }
  0x11   :  { %1580 = shalt.err (!%p1577_p7)
}
  0x12   :  { %s1678_s19 = smov 64   ;;  %s1679_s20 = smov 4  }
  0x13   :  { %44 = dma.hbm_to_vmem [thread:$0]  %s2050_s2, 3072, %s39_s10, [#allocation7], %s1678_s19, %s1678_s19, %s1679_s20  }
  0x14   :  { %s1680_s23 = smov [#allocation3]   ;;  %s1581_s27 = scalar_lea.hbm %s2049_s1, 512 }
  0x15   :  { %s26_s24 = sshll.u32 %s1680_s23, 4  ;;  %p1582_p8 = scmp.ne.s32.totalorder %s2049_s1, %s1581_s27  ;;  %s27_s24 = int_to_ptr.vmem [resolvable:$true] %s26_s24 }
  0x16   :  { %p1585_p9 = scmp.lt.u32.totalorder %s1581_s27, %s2049_s1 }
  0x18   :  { %p1587_p10 = pnand %p1585_p9, %p1582_p8 }
  0x1a   :  { %1590 = shalt.err (!%p1587_p10)
}
  0x1b   :  { %s1591_s12 = scalar_lea.vmem %s27_s24, 512  ;;  %p1596_p12 = scmp.lt.s32.totalorder %s27_s24, %s27_s24 }
  0x1c   :  { %p1592_p11 = scmp.ne.s32.totalorder %s27_s24, %s1591_s12  ;;  %p1597_p13 = scmp.lt.s32.totalorder %s1591_s12, %s1591_s12 }
  0x1e   :  { %p1598_p0 = por %p1597_p13, %p1596_p12 }
  0x20   :  { %p1599_p1 = pnand %p1598_p0, %p1592_p11 }
  0x22   :  { %1602 = shalt.err (!%p1599_p1)
}
  0x23   :  { %s1681_s2 = smov 128   ;;  %s1682_s10 = smov 8  }
  0x24   :  { %32 = dma.hbm_to_vmem [thread:$0]  %s2049_s1, 512, %s27_s24, [#allocation4], %s1681_s2, %s1681_s2, %s1682_s10  }
  0x25   :  { %s1683_s15 = smov [#allocation8]   ;;  %s1684_s17 = smov [#allocation9]  }
  0x26   :  { %s50_s16 = sshll.u32 %s1683_s15, 4  ;;  %s70_s18 = sshll.u32 %s1684_s17, 4  ;;  %s51_s16 = int_to_ptr.vmem [resolvable:$true] %s50_s16  ;;  %s1771_s18 = int_to_ptr.vmem [resolvable:$true] %s70_s18 }
  0x27   :  { %s1603_s23 = scalar_lea.hbm %s2051_s3, 3072 }
  0x28   :  { %p1604_p2 = scmp.ne.s32.totalorder %s2051_s3, %s1603_s23  ;;  %p1607_p3 = scmp.lt.u32.totalorder %s1603_s23, %s2051_s3 }
  0x2a   :  { %p1609_p4 = pnand %p1607_p3, %p1604_p2 }
  0x2c   :  { %1612 = shalt.err (!%p1609_p4)
}
  0x2d   :  { %s1613_s1 = scalar_lea.vmem %s51_s16, 3072  ;;  %p1618_p6 = scmp.lt.s32.totalorder %s51_s16, %s51_s16 }
  0x2e   :  { %p1614_p5 = scmp.ne.s32.totalorder %s51_s16, %s1613_s1  ;;  %p1619_p7 = scmp.lt.s32.totalorder %s1613_s1, %s1613_s1 }
  0x30   :  { %p1620_p8 = por %p1619_p7, %p1618_p6 }
  0x32   :  { %p1621_p9 = pnand %p1620_p8, %p1614_p5 }
  0x34   :  { %1624 = shalt.err (!%p1621_p9)
}
  0x35   :  { %56 = dma.hbm_to_vmem [thread:$0]  %s2051_s3, 3072, %s51_s16, [#allocation7], %s1678_s19, %s1678_s19, %s1679_s20  }
  0x36   :  { %s1625_s12 = scalar_lea.hbm %s2056_s8, 2048 }
  0x37   :  { %p1626_p10 = scmp.ne.s32.totalorder %s2056_s8, %s1625_s12  ;;  %p1629_p11 = scmp.lt.u32.totalorder %s1625_s12, %s2056_s8 }
  0x39   :  { %p1631_p12 = pnand %p1629_p11, %p1626_p10 }
  0x3b   :  { %1634 = shalt.err (!%p1631_p12)
}
  0x3c   :  { %s1635_s21 = scalar_lea.vmem %s1771_s18, 2048  ;;  %p1640_p0 = scmp.lt.s32.totalorder %s1771_s18, %s1771_s18 }
  0x3d   :  { %p1636_p13 = scmp.ne.s32.totalorder %s1771_s18, %s1635_s21  ;;  %p1641_p1 = scmp.lt.s32.totalorder %s1635_s21, %s1635_s21 }
  0x3f   :  { %p1642_p2 = por %p1641_p1, %p1640_p0 }
  0x41   :  { %p1643_p3 = pnand %p1642_p2, %p1636_p13 }
  0x43   :  { %1646 = shalt.err (!%p1643_p3)
}
  0x44   :  { %76 = dma.hbm_to_vmem [thread:$0]  %s2056_s8, 2048, %s1771_s18, [#allocation10], %s1681_s2, %s1681_s2, %s1682_s10  }
  0x45   :  { %1669 = dma.done.wait [#allocation4], 512  }
  0x46   :  { %1670 = vsyncadd [#allocation4], 4294966784 }
  0x47   :  { %1671 = dma.done.wait [#allocation7], 6144  }
  0x48   :  { %1672 = vsyncadd [#allocation7], 4294961152 }
  0x49   :  { %1673 = dma.done.wait [#allocation10], 2048  }
  0x4a   :  { %1674 = vsyncadd [#allocation10], 4294965248  ;;  %v1507_v0 = vld [vmem:[#allocation6 + $0x40] sm:$0xff]   ;;  %v1510_v3 = vld [vmem:[#allocation6 + $0x48] sm:$0xff]   ;;  %v106_v8 = vlaneseq  ;;  %vm1685_vm5 = vmmov 1   ;;  %vm1687_vm11 = vmmov 0  }
  0x4b   :  { %v1508_v1 = vld [vmem:[#allocation6] sm:$0xff]   ;;  %1225 = vmatprep.subr.bf16.mxu0 %v1507_v0  ;;  %v1511_v4 = vld [vmem:[#allocation6 + $0x8] sm:$0xff]   ;;  %v1513_v6 = vld [vmem:[#allocation6 + $0x50] sm:$0xff]   ;;  %vm515_vm12 = vcmask 1040384   ;;  %s1690_s26 = smov [#allocation11]  }
  0x4c   :  { %v1509_v2 = vld [vmem:[#allocation6 + $0x80] sm:$0xff]   ;;  %1226 = vmatpush3.bf16.msra.mxu0 %v1508_v1  ;;  %v1512_v5 = vld [vmem:[#allocation6 + $0x88] sm:$0xff]   ;;  %v1514_v7 = vld [vmem:[#allocation6 + $0x10] sm:$0xff]   ;;  %v1808_v13 = vshrl.u32 %v106_v8, 7  ;;  %s1127_s27 = sshll.u32 %s1690_s26, 4  ;;  %s1128_s27 = int_to_ptr.vmem [resolvable:$true] %s1127_s27 }
  0x4d   :  { %1335 = vmatprep.subr.bf16.mxu1 %v1509_v2  ;;  %1227 = vmatprep.subr.bf16.mxu0 %v1510_v3  ;;  %v1515_v9 = vld [vmem:[#allocation6 + $0x90] sm:$0xff]   ;;  %v1516_v10 = vld [vmem:[#allocation6 + $0x58] sm:$0xff]   ;;  %v1519_v14 = vld [vmem:[#allocation6 + $0x60] sm:$0xff]   ;;  %p1652_p5 = scmp.lt.s32.totalorder %s1128_s27, %s1128_s27 }
  0x4e   :  { %1336 = vmatpush3.bf16.msra.mxu1 %v1509_v2  ;;  %v1517_v11 = vld [vmem:[#allocation6 + $0x18] sm:$0xff]   ;;  %v1521_v15 = vld [vmem:[#allocation6 + $0xa0] sm:$0xff]   ;;  %v108_v17 = vadd.s32 8, %v1808_v13  ;;  %v1522_v18 = vld [vmem:[#allocation6 + $0x68] sm:$0xff]   ;;  %v110_v19 = vadd.s32 24, %v1808_v13  ;;  %v115_v20 = vand.u32 15, %v1808_v13 }
  0x4f   :  { %1337 = vmatprep.subr.bf16.mxu1 %v1512_v5  ;;  %v1518_v12 = vld [vmem:[#allocation6 + $0x98] sm:$0xff]   ;;  %v1520_v16 = vld [vmem:[#allocation6 + $0x20] sm:$0xff]   ;;  %v1524_v21 = vld [vmem:[#allocation6 + $0xa8] sm:$0xff]   ;;  %v109_v22 = vadd.s32 16, %v1808_v13  ;;  %vm171_vm0 = vcmp.lt.s32.totalorder %v1808_v13, 1  ;;  %vm188_vm1 = vcmp.lt.s32.totalorder %v1808_v13, 7 }
  0x50   :  { %1228 = vmatpush3.bf16.msra.mxu0 %v1511_v4  ;;  %v1523_v23 = vld [vmem:[#allocation6 + $0x28] sm:$0xff]   ;;  %v122_v24 = vand.u32 15, %v108_v17  ;;  %v1525_v25 = vld [vmem:[#allocation6 + $0x70] sm:$0xff]   ;;  %v136_v26 = vand.u32 15, %v110_v19  ;;  %v1528_v29 = vld [vmem:[#allocation6 + $0x78] sm:$0xff]   ;;  %vm1816_vm2 = vcmp.ne.s32.totalorder %v115_v20, 0 }
  0x51   :  { %1229 = vmatprep.subr.bf16.mxu0 %v1513_v6  ;;  %v1526_v27 = vld [vmem:[#allocation6 + $0x30] sm:$0xff]   ;;  %v1530_v31 = vld [vmem:[#allocation6 + $0xb8] sm:$0xff]   ;;  %v1820_v32 = vld [vmem:[#allocation3] sm:$0xff]  ;;  %v129_v37 = vand.u32 15, %v109_v22 }
  0x52   :  { %1338 = vmatpush3.bf16.msra.mxu1 %v1512_v5  ;;  %v1527_v28 = vld [vmem:[#allocation6 + $0xb0] sm:$0xff]   ;;  %v1822_v33 = vld [vmem:[#allocation3 + $0x8] sm:$0xff]  ;;  %v1824_v34 = vld [vmem:[#allocation3 + $0x18] sm:$0xff]  ;;  %vm1826_vm3 = vcmp.ne.s32.totalorder %v122_v24, 15  ;;  %vm1830_vm4 = vcmp.ne.s32.totalorder %v136_v26, 15  ;;  %v167_v39 = vrot.slane %v1820_v32, 7 }
  0x53   :  { %1339 = vmatprep.subr.bf16.mxu1 %v1515_v9  ;;  %v1529_v38 = vld [vmem:[#allocation6 + $0x38] sm:$0xff]   ;;  %v168_v40 = vrot.slane %v1822_v33, 7  ;;  %v198_v41 = vpack.c.bf16 %v1822_v33, %v1820_v32  ;;  %v170_v42 = vrot.slane %v1824_v34, 7  ;;  %v1839_v43 = vld [vmem:[#allocation3 + $0x10] sm:$0xff]  ;;  %vm1844_vm6 = vmpackc.low %vm1685_vm5, %vm1816_vm2  ;;  %v184_v45 = vrot.slane %v1820_v32, 1 }
  0x54   :  { %1230 = vmatpush3.bf16.msra.mxu0 %v1514_v7  ;;  %v185_v46 = vrot.slane %v1822_v33, 1  ;;  %v186_v47 = vrot.slane %v1839_v43, 1  ;;  %v187_v48 = vrot.slane %v1824_v34, 1  ;;  %vm1859_vm7 = vmpackc.low %vm1826_vm3, %vm1685_vm5  ;;  %v169_v55 = vrot.slane %v1839_v43, 7  ;;  %v90_v2 = vld [vmem:[#allocation9] sm:$0xff]  ;;  %v91_v3 = vld [vmem:[#allocation9 + $0x8] sm:$0xff] }
  0x55   :  { %1231 = vmatprep.subr.bf16.mxu0 %v1516_v10  ;;  %427 = vmatprep.mubr.bf16.mxu0 %v198_v41  ;;  %v174_v49 = vsel %vm171_vm0, %v167_v39, %v168_v40  ;;  %v175_v50 = vsel %vm171_vm0, %v170_v42, %v167_v39  ;;  %vm1870_vm8 = vmpackc.low %vm1830_vm4, %vm1685_vm5  ;;  %vm1222_vm9 = vcmp.ne.s32.totalorder %v129_v37, 0  ;;  %v201_v60 = vpack.c.bf16 %v1824_v34, %v1839_v43  ;;  %v92_v6 = vld [vmem:[#allocation9 + $0x10] sm:$0xff]  ;;  %v93_v7 = vld [vmem:[#allocation9 + $0x18] sm:$0xff] }
  0x56   :  { %1340 = vmatpush3.bf16.msra.mxu1 %v1515_v9  ;;  %v190_v52 = vsel %vm188_vm1, %v185_v46, %v186_v47  ;;  %v191_v53 = vsel %vm188_vm1, %v184_v45, %v185_v46  ;;  %v189_v57 = vsel %vm188_vm1, %v186_v47, %v187_v48  ;;  %v192_v58 = vsel %vm188_vm1, %v187_v48, %v184_v45  ;;  %vm1884_vm10 = vmpackc.low %vm1685_vm5, %vm1222_vm9  ;;  %v94_v9 = vld [vmem:[#allocation9 + $0x20] sm:$0xff]  ;;  %v95_v10 = vld [vmem:[#allocation9 + $0x28] sm:$0xff] }
  0x57   :  { %1341 = vmatprep.subr.bf16.mxu1 %v1518_v12  ;;  %v1175_v56 = vpack.c.bf16 %v190_v52, %v191_v53  ;;  %v1167_v59 = vpack.c.bf16 %v174_v49, %v175_v50  ;;  %v1179_v62 = vpack.c.bf16 %v192_v58, %v189_v57  ;;  %v172_v63 = vsel %vm171_vm0, %v169_v55, %v170_v42  ;;  %v99_v17 = vld [vmem:[#allocation9 + $0x48] sm:$0xff]  ;;  %v100_v19 = vld [vmem:[#allocation9 + $0x50] sm:$0xff]  ;;  %v101_v20 = vld [vmem:[#allocation9 + $0x58] sm:$0xff] }
  0x58   :  { %1232 = vmatpush3.bf16.msra.mxu0 %v1517_v11  ;;  %v173_v0 = vsel %vm171_vm0, %v168_v40, %v169_v55  ;;  %v1898_v4 = vpack.c.bf16 %v91_v3, %v90_v2  ;;  %v1686_v5 = vmov 0.0|0.0   ;;  %v1903_v8 = vpack.c.bf16 %v93_v7, %v92_v6  ;;  %v102_v22 = vld [vmem:[#allocation9 + $0x60] sm:$0xff]  ;;  %v105_v26 = vld [vmem:[#allocation9 + $0x78] sm:$0xff] }
  0x59   :  { %1233 = vmatprep.subr.bf16.mxu0 %v1519_v14  ;;  %1351 = vmatprep.mubr.msk.bf16.mxu1 %vm1859_vm7, %v1175_v56  ;;  %v1171_v1 = vpack.c.bf16 %v172_v63, %v173_v0  ;;  %v1907_v11 = vpack.c.bf16 %v95_v10, %v94_v9  ;;  %v97_v14 = vld [vmem:[#allocation9 + $0x38] sm:$0xff] }
  0x5a   :  { %1342 = vmatpush3.bf16.msra.mxu1 %v1518_v12  ;;  %v96_v12 = vld [vmem:[#allocation9 + $0x30] sm:$0xff] }
  0x5b   :  { %1343 = vmatprep.subr.bf16.mxu1 %v1521_v15 }
  0x5c   :  { %1234 = vmatpush3.bf16.msra.mxu0 %v1520_v16  ;;  %v98_v16 = vld [vmem:[#allocation9 + $0x40] sm:$0xff] }
  0x5d   :  { %1235 = vmatprep.subr.bf16.mxu0 %v1522_v18  ;;  %v1915_v18 = vpack.c.bf16 %v99_v17, %v98_v16 }
  0x5e   :  { %1344 = vmatpush3.bf16.msra.mxu1 %v1521_v15  ;;  %v1911_v15 = vpack.c.bf16 %v97_v14, %v96_v12 }
  0x5f   :  { %1345 = vmatprep.subr.bf16.mxu1 %v1524_v21 }
  0x60   :  { %1236 = vmatpush3.bf16.msra.mxu0 %v1523_v23  ;;  %v103_v23 = vld [vmem:[#allocation9 + $0x68] sm:$0xff] }
  0x61   :  { %1237 = vmatprep.subr.bf16.mxu0 %v1525_v25  ;;  %v1923_v24 = vpack.c.bf16 %v103_v23, %v102_v22  ;;  %v104_v25 = vld [vmem:[#allocation9 + $0x70] sm:$0xff] }
  0x62   :  { %1346 = vmatpush3.bf16.msra.mxu1 %v1524_v21  ;;  %v1919_v21 = vpack.c.bf16 %v101_v20, %v100_v19 }
  0x63   :  { %1347 = vmatprep.subr.bf16.mxu1 %v1527_v28 }
  0x64   :  { %1238 = vmatpush3.bf16.msra.mxu0 %v1526_v27  ;;  %v1688_v27 = vmov 0.0  }
  0x65   :  { %1239 = vmatprep.subr.bf16.mxu0 %v1528_v29 }
  0x66   :  { %1348 = vmatpush3.bf16.msra.mxu1 %v1527_v28  ;;  %v1928_v28 = vpack.c.bf16 %v105_v26, %v104_v25  ;;  %v1531_v25 = vld [vmem:[#allocation8 + $0x40] sm:$0xff]  }
  0x67   :  { %1349 = vmatprep.subr.bf16.mxu1 %v1530_v31  ;;  %v1532_v26 = vld [vmem:[#allocation8] sm:$0xff]  }
  0x68   :  { %1240 = vmatpush3.bf16.msra.mxu0 %v1529_v38 }
  0x69   :  { %1445 = vmatprep.subr.bf16.mxu0 %v1686_v5 }
  0x6a   :  { %1350 = vmatpush3.bf16.msra.mxu1 %v1530_v31 }
  0x6b   :  { %1168 = vmatmul.mubr.msk.bf16.vlgmr.msra.gmra.mrb[0].mxu0 %vm1844_vm6, %v1167_v59  ;;  %1280 = vmatprep.subr.bf16.mxu1 %v1531_v25 }
  0x6c   :  { %435 = vmatprep.mubr.bf16.mxu0 %v201_v60  ;;  %1447 = vmatpush3.bf16.msra.mxu0 %v1898_v4 }
  0x6d   :  { %1352 = vmatmul.mubr.msk.bf16.vlgmr.msra.gmra.mrb[0].mxu1 %vm1870_vm8, %v1179_v62  ;;  %1448 = vmatprep.subr.bf16.mxu0 %v1686_v5 }
  0x6e   :  { %1281 = vmatpush3.bf16.msra.mxu1 %v1532_v26  ;;  %v614_v26 = vld [vmem:[%s2053_s5] sm:$0x1] }
  0x70   :  { %1450 = vmatpush3.bf16.msra.mxu0 %v1903_v8 }
  0x71   :  { %1451 = vmatprep.subr.bf16.mxu0 %v1686_v5 }
  0x73   :  { %1172 = vmatmul.mubr.msk.bf16.gmra.mrb[4].mxu0 %vm1884_vm10, %v1171_v1 }
  0x74   :  { %1453 = vmatpush3.bf16.msra.mxu0 %v1907_v11  ;;  %1387 = vmatprep.mubr.msk.f32.mxu0 %vm1687_vm11, %v1688_v27 }
  0x75   :  { %1454 = vmatprep.subr.bf16.mxu0 %v1686_v5 }
  0x78   :  { %1456 = vmatpush3.bf16.msra.mxu0 %v1911_v15 }
  0x79   :  { %1457 = vmatprep.subr.bf16.mxu0 %v1686_v5 }
  0x7c   :  { %1459 = vmatpush3.bf16.msra.mxu0 %v1915_v18 }
  0x7d   :  { %1460 = vmatprep.subr.bf16.mxu0 %v1686_v5 }
  0x80   :  { %1462 = vmatpush3.bf16.msra.mxu0 %v1919_v21 }
  0x81   :  { %1463 = vmatprep.subr.bf16.mxu0 %v1686_v5 }
  0x84   :  { %1465 = vmatpush3.bf16.msra.mxu0 %v1923_v24 }
  0x85   :  { %1466 = vmatprep.subr.bf16.mxu0 %v1686_v5 }
  0x88   :  { %1468 = vmatpush3.bf16.msra.mxu0 %v1928_v28 }
 0x13e   :  { %v1241_v29 = vpop.f32.mrb[0].mxu0 }
 0x13f   :  { %v1242_v30 = vpop.f32.mrb[1].mxu0 }
 0x140   :  { %v1243_v31 = vadd.f32 %v1242_v30, %v1241_v29  ;;  %v1244_v35 = vpop.f32.mrb[2].mxu0  ;;  %v1353_v36 = vpop.f32.mrb[0].mxu1  ;;  %v1533_v29 = vld [vmem:[#allocation8 + $0x80] sm:$0xff]   ;;  %v1534_v30 = vld [vmem:[#allocation8 + $0x48] sm:$0xff]  }
 0x141   :  { %v1245_v37 = vpop.f32.mrb[3].mxu0  ;;  %v478_v38 = vpop.f32.mrb[1].mxu1  ;;  %1390 = vmatprep.subr.bf16.mxu0 %v1533_v29  ;;  %1282 = vmatprep.subr.bf16.mxu1 %v1534_v30 }
 0x142   :  { %v1246_v39 = vadd.f32 %v1245_v37, %v1244_v35  ;;  %v1932_v40 = vadd.f32 %v1243_v31, %v478_v38  ;;  %v1354_v41 = vpop.f32.mrb[2].mxu1  ;;  %v1535_v31 = vld [vmem:[#allocation8 + $0x8] sm:$0xff]   ;;  %v1538_v37 = vld [vmem:[#allocation8 + $0x10] sm:$0xff]  }
 0x143   :  { %v481_v42 = vpop.f32.mrb[3].mxu1  ;;  %v1536_v35 = vld [vmem:[#allocation8 + $0x88] sm:$0xff]   ;;  %1283 = vmatpush3.bf16.msra.mxu1 %v1535_v31  ;;  %v1539_v38 = vld [vmem:[#allocation8 + $0x90] sm:$0xff]  }
 0x144   :  { %v1934_v45 = vadd.f32 %v1246_v39, %v481_v42  ;;  %v502_v53 = vmul.f32 %v1932_v40, %v1932_v40  ;;  %v1540_v39 = vld [vmem:[#allocation8 + $0x58] sm:$0xff]  }
 0x145   :  { %v1542_v42 = vld [vmem:[#allocation8 + $0x98] sm:$0xff]  }
 0x146   :  { %v1247_v46 = vpop.f32.mrb[4].mxu0  ;;  %v503_v48 = vmul.f32 %v1934_v45, %v1934_v45  ;;  %v493_v55 = vadd.f32 %v1934_v45, %v1932_v40 }
 0x147   :  { %v1248_v47 = vpop.f32.mrb[5].mxu0 }
 0x148   :  { %v1249_v49 = vadd.f32 %v1248_v47, %v1247_v46  ;;  %v1250_v50 = vpop.f32.mrb[6].mxu0  ;;  %v506_v58 = vadd.f32 %v503_v48, %v502_v53  ;;  %v1543_v46 = vld [vmem:[#allocation8 + $0x60] sm:$0xff]   ;;  %v1549_v53 = vld [vmem:[#allocation8 + $0x70] sm:$0xff]  }
 0x149   :  { %v1251_v52 = vpop.f32.mrb[7].mxu0  ;;  %v1544_v47 = vld [vmem:[#allocation8 + $0x20] sm:$0xff]  }
 0x14a   :  { %v1942_v56 = vadd.f32 %v1353_v36, %v1249_v49  ;;  %v1252_v57 = vadd.f32 %v1251_v52, %v1250_v50  ;;  %v1537_v36 = vld [vmem:[#allocation8 + $0x50] sm:$0xff]   ;;  %v1545_v48 = vld [vmem:[#allocation8 + $0xa0] sm:$0xff]   ;;  %v1546_v49 = vld [vmem:[#allocation8 + $0x68] sm:$0xff]  }
 0x14b   :  { %1284 = vmatprep.subr.bf16.mxu1 %v1537_v36  ;;  %v1547_v50 = vld [vmem:[#allocation8 + $0x28] sm:$0xff]  }
 0x14c   :  { %v494_v59 = vadd.f32 %v493_v55, %v1942_v56  ;;  %v504_v60 = vmul.f32 %v1942_v56, %v1942_v56  ;;  %v1947_v62 = vadd.f32 %v1354_v41, %v1252_v57  ;;  %1285 = vmatpush3.bf16.msra.mxu1 %v1538_v37  ;;  %v1541_v41 = vld [vmem:[#allocation8 + $0x18] sm:$0xff]   ;;  %v1548_v52 = vld [vmem:[#allocation8 + $0xa8] sm:$0xff]   ;;  %v1550_v55 = vld [vmem:[#allocation8 + $0x30] sm:$0xff]  }
 0x14d   :  { %1286 = vmatprep.subr.bf16.mxu1 %v1540_v39  ;;  %v1551_v57 = vld [vmem:[#allocation8 + $0xb0] sm:$0xff]  }
 0x14e   :  { %v507_v63 = vadd.f32 %v506_v58, %v504_v60  ;;  %v495_v0 = vadd.f32 %v494_v59, %v1947_v62  ;;  %v505_v1 = vmul.f32 %v1947_v62, %v1947_v62  ;;  %v1552_v58 = vld [vmem:[#allocation8 + $0x78] sm:$0xff]  }
 0x14f   :  { %v1553_v59 = vld [vmem:[#allocation8 + $0x38] sm:$0xff]  }
 0x150   :  { %v496_v2 = vrot.slane %v495_v0, 4  ;;  %v508_v3 = vadd.f32 %v507_v63, %v505_v1  ;;  %1287 = vmatpush3.bf16.msra.mxu1 %v1541_v41  ;;  %v1554_v60 = vld [vmem:[#allocation8 + $0xb8] sm:$0xff]   ;;  %v642_v41 = vstv %s2048_s0 }
 0x151   :  { %1288 = vmatprep.subr.bf16.mxu1 %v1543_v46 }
 0x152   :  { %v497_v6 = vadd.f32 %v496_v2, %v495_v0  ;;  %v509_v7 = vrot.slane %v508_v3, 4 }
 0x154   :  { %v498_v9 = vrot.slane %v497_v6, 2  ;;  %v510_v10 = vadd.f32 %v509_v7, %v508_v3  ;;  %1289 = vmatpush3.bf16.msra.mxu1 %v1544_v47 }
 0x155   :  { %1290 = vmatprep.subr.bf16.mxu1 %v1546_v49 }
 0x156   :  { %v499_v12 = vadd.f32 %v498_v9, %v497_v6  ;;  %v511_v14 = vrot.slane %v510_v10, 2  ;;  %v1689_v9 = vmov 1966171168  }
 0x158   :  { %v500_v16 = vrot.slane %v499_v12, 1  ;;  %v512_v17 = vadd.f32 %v511_v14, %v510_v10  ;;  %1291 = vmatpush3.bf16.msra.mxu1 %v1547_v50  ;;  %v598_v10 = vunpack.c.l.s4 %v1689_v9 }
 0x159   :  { %1292 = vmatprep.subr.bf16.mxu1 %v1549_v53 }
 0x15a   :  { %v513_v19 = vrot.slane %v512_v17, 1  ;;  %v501_v20 = vadd.f32 %v500_v16, %v499_v12  ;;  %v599_v12 = vunpack.c.0.s8 %v598_v10 }
 0x15c   :  { %v514_v22 = vadd.f32 %v513_v19, %v512_v17  ;;  %1293 = vmatpush3.bf16.msra.mxu1 %v1550_v55  ;;  %v1955_v14 = vsub.s32 %v599_v12, %v1808_v13 }
 0x15d   :  { %1294 = vmatprep.subr.bf16.mxu1 %v1552_v58 }
 0x15e   :  { %v516_v23 = vsel %vm515_vm12, %v501_v20, %v514_v22  ;;  %v593_v20 = vld [vmem:[%s2052_s4] sm:$0x1] }
 0x15f   :  { %1388 = vmatmul.mubr.f32.vlgmr.msra.gmra.mrb[8].mxu0 %v516_v23  ;;  %v1963_v23 = vsub.s32 0, %v1808_v13 }
 0x160   :  { %1391 = vmatpush3.bf16.msra.mxu0 %v1533_v29  ;;  %1295 = vmatpush3.bf16.msra.mxu1 %v1553_v59 }
 0x161   :  { %1392 = vmatprep.subr.bf16.mxu0 %v1536_v35  ;;  %1469 = vmatprep.subr.bf16.mxu1 %v1686_v5 }
 0x164   :  { %1393 = vmatpush3.bf16.msra.mxu0 %v1536_v35 }
 0x165   :  { %1394 = vmatprep.subr.bf16.mxu0 %v1539_v38 }
 0x168   :  { %1395 = vmatpush3.bf16.msra.mxu0 %v1539_v38 }
 0x169   :  { %1396 = vmatprep.subr.bf16.mxu0 %v1542_v42 }
 0x16c   :  { %1397 = vmatpush3.bf16.msra.mxu0 %v1542_v42 }
 0x16d   :  { %1398 = vmatprep.subr.bf16.mxu0 %v1545_v48 }
 0x170   :  { %1399 = vmatpush3.bf16.msra.mxu0 %v1545_v48 }
 0x171   :  { %1400 = vmatprep.subr.bf16.mxu0 %v1548_v52 }
 0x174   :  { %1401 = vmatpush3.bf16.msra.mxu0 %v1548_v52 }
 0x175   :  { %1402 = vmatprep.subr.bf16.mxu0 %v1551_v57 }
 0x178   :  { %1403 = vmatpush3.bf16.msra.mxu0 %v1551_v57 }
 0x179   :  { %1404 = vmatprep.subr.bf16.mxu0 %v1554_v60 }
 0x17c   :  { %1405 = vmatpush3.bf16.msra.mxu0 %v1554_v60 }
 0x232   :  { %v583_v63 = vpop.f32.mrb[8].mxu0 }
 0x233   :  { %v587_v0 = vmul.f32 %v583_v63, %v583_v63  ;;  %v1389_v1 = vpop.f32.mrb[9].mxu0 }
 0x235   :  { %v589_v2 = vrot.slane %v587_v0, 7 }
 0x237   :  { %v591_v3 = vsub.f32 %v583_v63, %v589_v2 }
 0x239   :  { %v592_v6 = vmax.f32 %v591_v3, 0.0 }
 0x23b   :  { %v594_v7 = vadd.f32 1e-05, %v592_v6 }
 0x23d   :  { %1555 = vrsqrt.f32 %v594_v7 }
 0x247   :  { %v1556_v16 = vpop.eup %1555 }
 0x248   :  { %v603_v17 = vrot.slane %v1556_v16, %v1955_v14 }
 0x24a   :  { %v604_v19 = vcombine.high %v603_v17, %v603_v17 }
 0x24c   :  { %v611_v22 = vrot.slane %v604_v19, %v1955_v14 }
 0x24e   :  { %v613_v25 = vmul.f32 %v611_v22, %v593_v20 }
 0x250   :  { %v615_v29 = vmul.f32 %v613_v25, %v583_v63  ;;  %v621_v30 = vrot.slane %v613_v25, %v1963_v23 }
 0x252   :  { %v616_v31 = vsub.f32 %v614_v26, %v615_v29  ;;  %v625_v35 = vmul.f32 %v621_v30, %v1942_v56  ;;  %v626_v36 = vmul.f32 %v621_v30, %v1947_v62  ;;  %v623_v38 = vmul.f32 %v621_v30, %v1932_v40 }
 0x253   :  { %v624_v39 = vmul.f32 %v621_v30, %v1934_v45 }
 0x254   :  { %v631_v37 = vrot.slane %v616_v31, %v1963_v23 }
 0x256   :  { %v635_v42 = vadd.f32 %v631_v37, %v625_v35  ;;  %v636_v46 = vadd.f32 %v631_v37, %v626_v36  ;;  %v633_v47 = vadd.f32 %v631_v37, %v623_v38  ;;  %v634_v48 = vadd.f32 %v631_v37, %v624_v39 }
 0x258   :  { %vm641_vm13 = vcmp.gt.f32.partialorder %v636_v46, 0.0  ;;  %vm638_vm14 = vcmp.gt.f32.partialorder %v633_v47, 0.0  ;;  %vm639_vm15 = vcmp.gt.f32.partialorder %v634_v48, 0.0  ;;  %v643_v56 = vmul.f32 %v642_v41, %v633_v47 }
 0x259   :  { %v644_v49 = vmul.f32 %v642_v41, %v634_v48  ;;  %v645_v62 = vmul.f32 %v642_v41, %v635_v42  ;;  %v646_v50 = vmul.f32 %v642_v41, %v636_v46  ;;  %vm640_vm2 = vcmp.gt.f32.partialorder %v635_v42, 0.0 }
 0x25a   :  { %v647_v52 = vsel %vm638_vm14, %v633_v47, %v643_v56 }
 0x25b   :  { %v648_v40 = vsel %vm639_vm15, %v634_v48, %v644_v49  ;;  %v651_v53 = vrot.slane %v647_v52, 7  ;;  %v663_v45 = vrot.slane %v647_v52, 1  ;;  %v650_v55 = vsel %vm641_vm13, %v636_v46, %v646_v50 }
 0x25c   :  { %v652_v57 = vrot.slane %v648_v40, 7  ;;  %v664_v58 = vrot.slane %v648_v40, 1  ;;  %v676_v59 = vpack.c.bf16 %v648_v40, %v647_v52  ;;  %v654_v60 = vrot.slane %v650_v55, 7 }
 0x25d   :  { %v649_v63 = vsel %vm640_vm2, %v635_v42, %v645_v62  ;;  %v666_v0 = vrot.slane %v650_v55, 1 }
 0x25e   :  { %905 = vmatprep.mubr.bf16.mxu1 %v676_v59  ;;  %v657_v1 = vsel %vm171_vm0, %v651_v53, %v652_v57  ;;  %v658_v2 = vsel %vm171_vm0, %v654_v60, %v651_v53  ;;  %v665_v3 = vrot.slane %v649_v63, 1  ;;  %v669_v6 = vsel %vm188_vm1, %v663_v45, %v664_v58 }
 0x25f   :  { %v1207_v7 = vpack.c.bf16 %v657_v1, %v658_v2  ;;  %v670_v9 = vsel %vm188_vm1, %v666_v0, %v663_v45  ;;  %v679_v12 = vpack.c.bf16 %v650_v55, %v649_v63  ;;  %v653_v17 = vrot.slane %v649_v63, 7 }
 0x260   :  { %v668_v10 = vsel %vm188_vm1, %v664_v58, %v665_v3  ;;  %v667_v16 = vsel %vm188_vm1, %v665_v3, %v666_v0 }
 0x261   :  { %1208 = vmatmul.mubr.msk.bf16.vlgmr.msra.gmra.mrb[4].mxu1 %vm1844_vm6, %v1207_v7  ;;  %v1215_v19 = vpack.c.bf16 %v668_v10, %v669_v6  ;;  %v1219_v20 = vpack.c.bf16 %v670_v9, %v667_v16  ;;  %v655_v22 = vsel %vm171_vm0, %v653_v17, %v654_v60  ;;  %v656_v44 = vsel %vm171_vm0, %v652_v57, %v653_v17 }
 0x262   :  { %913 = vmatprep.mubr.bf16.mxu1 %v679_v12  ;;  %1471 = vmatpush3.bf16.msra.mxu1 %v1898_v4  ;;  %v1211_v25 = vpack.c.bf16 %v655_v22, %v656_v44  ;;  %v1091_v44 = vld [vmem:[%s2055_s7] sm:$0x1] }
 0x263   :  { %1406 = vmatprep.mubr.msk.bf16.mxu0 %vm1859_vm7, %v1215_v19  ;;  %1472 = vmatprep.subr.bf16.mxu1 %v1686_v5  ;;  %v1070_v19 = vld [vmem:[%s2054_s6] sm:$0x1]  ;;  %s1647_s6 = scalar_lea.vmem %s1128_s27, 512 }
 0x264   :  { %1407 = vmatmul.mubr.msk.bf16.vlgmr.msra.gmra.mrb[12].mxu0 %vm1870_vm8, %v1219_v20  ;;  %p1648_p4 = scmp.ne.s32.totalorder %s1128_s27, %s1647_s6  ;;  %p1653_p6 = scmp.lt.s32.totalorder %s1647_s6, %s1647_s6 }
 0x266   :  { %1474 = vmatpush3.bf16.msra.mxu1 %v1903_v8  ;;  %p1654_p7 = por %p1653_p6, %p1652_p5 }
 0x267   :  { %1475 = vmatprep.subr.bf16.mxu1 %v1686_v5 }
 0x268   :  { %p1655_p8 = pnand %p1654_p7, %p1648_p4 }
 0x269   :  { %1212 = vmatmul.mubr.msk.bf16.gmra.mrb[8].mxu1 %vm1884_vm10, %v1211_v25 }
 0x26a   :  { %1477 = vmatpush3.bf16.msra.mxu1 %v1907_v11  ;;  %1442 = vmatprep.mubr.msk.f32.mxu1 %vm1687_vm11, %v1688_v27 }
 0x26b   :  { %1478 = vmatprep.subr.bf16.mxu1 %v1686_v5 }
 0x26e   :  { %1480 = vmatpush3.bf16.msra.mxu1 %v1911_v15 }
 0x26f   :  { %1481 = vmatprep.subr.bf16.mxu1 %v1686_v5 }
 0x272   :  { %1483 = vmatpush3.bf16.msra.mxu1 %v1915_v18 }
 0x273   :  { %1484 = vmatprep.subr.bf16.mxu1 %v1686_v5 }
 0x276   :  { %1486 = vmatpush3.bf16.msra.mxu1 %v1919_v21 }
 0x277   :  { %1487 = vmatprep.subr.bf16.mxu1 %v1686_v5 }
 0x27a   :  { %1489 = vmatpush3.bf16.msra.mxu1 %v1923_v24 }
 0x27b   :  { %1490 = vmatprep.subr.bf16.mxu1 %v1686_v5 }
 0x27e   :  { %1492 = vmatpush3.bf16.msra.mxu1 %v1928_v28 }
 0x334   :  { %v1296_v13 = vpop.f32.mrb[4].mxu1 }
 0x335   :  { %v1297_v51 = vpop.f32.mrb[5].mxu1 }
 0x336   :  { %v1298_v54 = vadd.f32 %v1297_v51, %v1296_v13  ;;  %v1299_v61 = vpop.f32.mrb[6].mxu1 }
 0x337   :  { %v1408_v4 = vpop.f32.mrb[12].mxu0  ;;  %v1300_v8 = vpop.f32.mrb[7].mxu1 }
 0x338   :  { %v956_v11 = vpop.f32.mrb[13].mxu0  ;;  %v1301_v15 = vadd.f32 %v1300_v8, %v1299_v61 }
 0x339   :  { %v957_v18 = vadd.f32 %v1298_v54, %v956_v11  ;;  %v1409_v27 = vpop.f32.mrb[14].mxu0 }
 0x33a   :  { %v959_v26 = vpop.f32.mrb[15].mxu0 }
 0x33b   :  { %v960_v21 = vadd.f32 %v1301_v15, %v959_v26  ;;  %v980_v36 = vmul.f32 %v957_v18, %v957_v18 }
 0x33c   :  { %v1302_v29 = vpop.f32.mrb[8].mxu1 }
 0x33d   :  { %v1303_v30 = vpop.f32.mrb[9].mxu1  ;;  %v981_v31 = vmul.f32 %v960_v21, %v960_v21  ;;  %v971_v28 = vadd.f32 %v960_v21, %v957_v18 }
 0x33e   :  { %v1304_v24 = vadd.f32 %v1303_v30, %v1302_v29  ;;  %v1305_v35 = vpop.f32.mrb[10].mxu1 }
 0x33f   :  { %v1306_v5 = vpop.f32.mrb[11].mxu1  ;;  %v984_v39 = vadd.f32 %v981_v31, %v980_v36 }
 0x340   :  { %v965_v37 = vadd.f32 %v1408_v4, %v1304_v24  ;;  %v1307_v38 = vadd.f32 %v1306_v5, %v1305_v35 }
 0x342   :  { %v972_v41 = vadd.f32 %v971_v28, %v965_v37  ;;  %v982_v42 = vmul.f32 %v965_v37, %v965_v37  ;;  %v968_v46 = vadd.f32 %v1409_v27, %v1307_v38 }
 0x344   :  { %v985_v47 = vadd.f32 %v984_v39, %v982_v42  ;;  %v973_v48 = vadd.f32 %v972_v41, %v968_v46  ;;  %v983_v56 = vmul.f32 %v968_v46, %v968_v46 }
 0x346   :  { %v974_v49 = vrot.slane %v973_v48, 4  ;;  %v986_v62 = vadd.f32 %v985_v47, %v983_v56 }
 0x348   :  { %v975_v50 = vadd.f32 %v974_v49, %v973_v48  ;;  %v987_v52 = vrot.slane %v986_v62, 4 }
 0x34a   :  { %v976_v40 = vrot.slane %v975_v50, 2  ;;  %v988_v53 = vadd.f32 %v987_v52, %v986_v62 }
 0x34c   :  { %v977_v45 = vadd.f32 %v976_v40, %v975_v50  ;;  %v989_v55 = vrot.slane %v988_v53, 2 }
 0x34e   :  { %v978_v57 = vrot.slane %v977_v45, 1  ;;  %v990_v58 = vadd.f32 %v989_v55, %v988_v53 }
 0x350   :  { %v991_v59 = vrot.slane %v990_v58, 1  ;;  %v979_v60 = vadd.f32 %v978_v57, %v977_v45 }
 0x352   :  { %v992_v63 = vadd.f32 %v991_v59, %v990_v58 }
 0x354   :  { %v993_v0 = vsel %vm515_vm12, %v979_v60, %v992_v63 }
 0x355   :  { %1443 = vmatmul.mubr.f32.vlgmr.msra.gmra.mrb[12].mxu1 %v993_v0 }
 0x428   :  { %v1060_v1 = vpop.f32.mrb[12].mxu1 }
 0x429   :  { %v1064_v2 = vmul.f32 %v1060_v1, %v1060_v1  ;;  %v1444_v3 = vpop.f32.mrb[13].mxu1 }
 0x42b   :  { %v1066_v6 = vrot.slane %v1064_v2, 7 }
 0x42d   :  { %v1068_v7 = vsub.f32 %v1060_v1, %v1066_v6 }
 0x42f   :  { %v1069_v9 = vmax.f32 %v1068_v7, 0.0 }
 0x431   :  { %v1071_v10 = vadd.f32 1e-05, %v1069_v9 }
 0x433   :  { %1557 = vrsqrt.f32 %v1071_v10 }
 0x43d   :  { %v1558_v12 = vpop.eup %1557 }
 0x43e   :  { %v1080_v16 = vrot.slane %v1558_v12, %v1955_v14 }
 0x440   :  { %v1081_v17 = vcombine.high %v1080_v16, %v1080_v16 }
 0x442   :  { %v1088_v20 = vrot.slane %v1081_v17, %v1955_v14 }
 0x444   :  { %v1090_v22 = vmul.f32 %v1088_v20, %v1070_v19 }
 0x446   :  { %v1092_v25 = vmul.f32 %v1090_v22, %v1060_v1  ;;  %v1098_v13 = vrot.slane %v1090_v22, %v1963_v23 }
 0x448   :  { %v1093_v51 = vsub.f32 %v1091_v44, %v1092_v25  ;;  %v1100_v54 = vmul.f32 %v1098_v13, %v957_v18  ;;  %v1101_v4 = vmul.f32 %v1098_v13, %v960_v21  ;;  %v1102_v8 = vmul.f32 %v1098_v13, %v965_v37 }
 0x449   :  { %v1103_v11 = vmul.f32 %v1098_v13, %v968_v46 }
 0x44a   :  { %v1108_v61 = vrot.slane %v1093_v51, %v1963_v23 }
 0x44c   :  { %v1110_v15 = vadd.f32 %v1108_v61, %v1100_v54  ;;  %v1111_v27 = vadd.f32 %v1108_v61, %v1101_v4  ;;  %v1112_v14 = vadd.f32 %v1108_v61, %v1102_v8  ;;  %v1113_v26 = vadd.f32 %v1108_v61, %v1103_v11 }
 0x44e   :  { %v1114_v29 = vadd.f32 %v1110_v15, %v1820_v32  ;;  %v1115_v30 = vadd.f32 %v1111_v27, %v1822_v33  ;;  %v1116_v31 = vadd.f32 %v1112_v14, %v1839_v43  ;;  %v1117_v24 = vadd.f32 %v1113_v26, %v1824_v34 }
 0x450   :  { %1118 = vst [vmem:[#allocation11] sm:$0xff] %v1114_v29  ;;  %1119 = vst [vmem:[#allocation11 + $0x8] sm:$0xff] %v1115_v30 }
 0x451   :  { %1120 = vst [vmem:[#allocation11 + $0x10] sm:$0xff] %v1116_v31  ;;  %1121 = vst [vmem:[#allocation11 + $0x18] sm:$0xff] %v1117_v24 }
 0x452   :  { %1658 = shalt.err (!%p1655_p8)
}
 0x453   :  { %s1659_s1 = scalar_lea.hbm %s2057_s9, 512 }
 0x454   :  { %p1660_p9 = scmp.ne.s32.totalorder %s2057_s9, %s1659_s1  ;;  %p1663_p10 = scmp.lt.u32.totalorder %s1659_s1, %s2057_s9 }
 0x456   :  { %p1665_p11 = pnand %p1663_p10, %p1660_p9 }
 0x458   :  { %1668 = shalt.err (!%p1665_p11)
}
 0x459   :  { %1133 = dma.vmem_to_hbm [thread:$0]  %s1128_s27, 512, %s2057_s9, [#allocation5], %s1681_s2, %s1681_s2, %s1682_s10  }
 0x45a   :  { %1675 = dma.done.wait [#allocation5], 512  }
 0x45b   :  { %1676 = vsyncadd [#allocation5], 4294966784 }
 0x45c   :  { %1137 = vsyncpa [#allocation4], 1 }
 0x45d   :  { %1138 = vsyncpa [#allocation7], 1 }
 0x45e   :  { %1139 = vsyncpa [#allocation10], 1 }
 0x45f   :  { %1140 = vsyncpa [#allocation5], 1 }

</bundles_post_ra>
